<compile_context>
chip_gen: v6e
topology: v6e:2x2x1
jax: 0.10.0
libtpu: 0.0.40
codegen_flags: <defaults>
</compile_context>

<pallas_src>
import functools

import jax
import jax.numpy as jnp
from jax import lax
from jax.experimental import pallas as pl
from jax.experimental.pallas import tpu as pltpu


def _round_up(x: int, m: int) -> int:
    return (x + m - 1) // m * m


def _fake_quant_weight_kernel(scale_ref, zp_ref, w_ref, wq_ref, *, qmin, qmax):
    """Per-tensor fake-quant of one (tn, tk) weight tile.

    Emits (quantized - zero_point) as bf16: values are exact small integers so
    the bf16 cast is lossless; the scale is applied after the matmul in f32.
    Zero padding quantizes exactly to 0 since zero_point is an in-range integer.
    """
    scale = scale_ref[0]
    zp = zp_ref[0]
    q = jnp.clip(jnp.round(w_ref[...] / scale + zp), qmin, qmax)
    wq_ref[...] = (q - zp).astype(wq_ref.dtype)


def _qlinear_matmul_kernel(scale_ref, x_ref, w_ref, b_ref, o_ref, acc_ref):
    """y = scale * (x @ (q - zp)^T) + b, tiled with K innermost and a resident
    f32 accumulator (init at k==0, finalize at k==K_tiles-1)."""
    k = pl.program_id(2)

    @pl.when(k == 0)
    def _():
        acc_ref[...] = jnp.zeros_like(acc_ref)

    # (tm, tk) . (tn, tk) contracting on K -> (tm, tn); bf16 in, f32 accumulate.
    acc_ref[...] += lax.dot_general(
        x_ref[...], w_ref[...],
        dimension_numbers=(((1,), (1,)), ((), ())),
        preferred_element_type=jnp.float32)

    @pl.when(k == pl.num_programs(2) - 1)
    def _():
        o_ref[...] = (scale_ref[0] * acc_ref[...] + b_ref[...]).astype(o_ref.dtype)


def quantized_linear(x, weight, bias=None, *, quantization_bits: int = 8,
                     tm: int | None = None, tn: int | None = None,
                     tk: int | None = None):
    """Forward of QuantizedLinear with dynamic_quantization=True (training mode)."""
    if quantization_bits == 8:
        qmin, qmax = -128, 127
    elif quantization_bits == 4:
        qmin, qmax = -8, 7
    else:
        qmin = -(2 ** (quantization_bits - 1))
        qmax = 2 ** (quantization_bits - 1) - 1

    N, K = weight.shape
    orig_leading = x.shape[:-1]
    x2d = x.reshape(-1, K).astype(jnp.float32)
    M = x2d.shape[0]
    w32 = weight.astype(jnp.float32)
    if bias is None:
        bias = jnp.zeros((N,), jnp.float32)
    b32 = bias.astype(jnp.float32)

    # ---- hoisted per-tensor scale / zero_point (tiny global XLA reduction) ----
    min_val = jnp.min(w32)
    max_val = jnp.max(w32)
    scale = (max_val - min_val) / float(qmax - qmin)
    # Guard degenerate constant-weight range (reference would divide by zero).
    scale = jnp.where(scale > 0.0, scale, jnp.float32(1.0)).astype(jnp.float32)
    zero_point = jnp.round(jnp.clip(float(qmin) - min_val / scale, qmin, qmax))
    scale_arr = scale.reshape(1).astype(jnp.float32)
    zp_arr = zero_point.reshape(1).astype(jnp.float32)

    # ---- tile sizes: lane-dense output (tn, tk multiples of 128; tm mult of 16)
    if tm is None:
        tm = min(256, _round_up(M, 16))
    if tn is None:
        tn = min(256, _round_up(N, 128))
    if tk is None:
        tk = min(512, _round_up(K, 128))

    Mp, Np, Kp = _round_up(M, tm), _round_up(N, tn), _round_up(K, tk)

    w_p = jnp.pad(w32, ((0, Np - N), (0, Kp - K)))
    x_p = jnp.pad(x2d, ((0, Mp - M), (0, Kp - K))).astype(jnp.bfloat16)
    b_p = jnp.pad(b32, (0, Np - N)).reshape(1, Np)

    # ---- one-shot fake-quant of the full weight (tiled, scale/zp in SMEM) ----
    wq = pl.pallas_call(
        functools.partial(_fake_quant_weight_kernel,
                          qmin=float(qmin), qmax=float(qmax)),
        out_shape=jax.ShapeDtypeStruct((Np, Kp), jnp.bfloat16),
        grid=(Np // tn, Kp // tk),
        in_specs=[
            pl.BlockSpec(memory_space=pltpu.MemorySpace.SMEM),   # scale (1,)
            pl.BlockSpec(memory_space=pltpu.MemorySpace.SMEM),   # zero_point (1,)
            pl.BlockSpec((tn, tk), lambda i, j: (i, j)),         # weight f32
        ],
        out_specs=pl.BlockSpec((tn, tk), lambda i, j: (i, j)),
        compiler_params=pltpu.CompilerParams(
            dimension_semantics=("parallel", "parallel")),
    )(scale_arr, zp_arr, w_p)

    # ---- tiled matmul: K innermost, resident f32 accumulator, bf16 MXU ----
    out = pl.pallas_call(
        _qlinear_matmul_kernel,
        out_shape=jax.ShapeDtypeStruct((Mp, Np), jnp.float32),
        grid=(Mp // tm, Np // tn, Kp // tk),
        in_specs=[
            pl.BlockSpec(memory_space=pltpu.MemorySpace.SMEM),   # scale (1,)
            pl.BlockSpec((tm, tk), lambda i, j, k: (i, k)),      # x (bf16)
            pl.BlockSpec((tn, tk), lambda i, j, k: (j, k)),      # q - zp (bf16)
            pl.BlockSpec((1, tn), lambda i, j, k: (0, j)),       # bias (f32)
        ],
        out_specs=pl.BlockSpec((tm, tn), lambda i, j, k: (i, j)),
        scratch_shapes=[pltpu.VMEM((tm, tn), jnp.float32)],
        compiler_params=pltpu.CompilerParams(
            dimension_semantics=("parallel", "parallel", "arbitrary")),
    )(scale_arr, x_p, wq, b_p)

    return out[:M, :N].reshape(orig_leading + (N,))


if __name__ == "__main__":
    # Deterministic parameter / input construction (synthetic, no checkpoint).
    in_features = 32
    out_features = 32
    batch, seq = 2, 8

    key = jax.random.PRNGKey(0)
    k_w, k_x = jax.random.split(key)

    # nn.Parameter(torch.randn(out_features, in_features))
    weight = jax.random.normal(k_w, (out_features, in_features), dtype=jnp.float32)
    # bias initialized to zeros in the module
    bias = jnp.zeros((out_features,), dtype=jnp.float32)

    x = jax.random.normal(k_x, (batch, seq, in_features), dtype=jnp.float32)

    y = quantized_linear(x, weight, bias, quantization_bits=8)
    jax.block_until_ready(y)
    assert y.shape == (batch, seq, out_features)

    # Loose sanity check vs pure-JAX per-tensor fake-quant reference
    # (tolerance accounts for bf16 MXU operands; weights' integer part is exact).
    qmn, qmx = -128.0, 127.0
    mn, mx = jnp.min(weight), jnp.max(weight)
    s = (mx - mn) / (qmx - qmn)
    zp = jnp.round(jnp.clip(qmn - mn / s, qmn, qmx))
    w_dq = s * (jnp.clip(jnp.round(weight / s + zp), qmn, qmx) - zp)
    ref = x @ w_dq.T + bias
    assert jnp.allclose(y, ref, rtol=5e-2, atol=5e-1), float(jnp.max(jnp.abs(y - ref)))

    print("KERNEL_OK")
</pallas_src>

<mosaic_0001>
module attributes {stable_mosaic.version = 11 : i64} {
  func.func @_fake_quant_weight_kernel(%arg0: i32, %arg1: i32, %arg2: memref<1xf32, #tpu.memory_space<smem>>, %arg3: memref<1xf32, #tpu.memory_space<smem>>, %arg4: memref<128x128xf32, #tpu.memory_space<vmem>>, %arg5: memref<128x128xbf16, #tpu.memory_space<vmem>>) attributes {dimension_semantics = [#tpu.dimension_semantics<parallel>, #tpu.dimension_semantics<parallel>], iteration_bounds = array<i64: 1, 1>, scalar_prefetch = 0 : i64, scratch_operands = 0 : i64, tpu.core_type = #tpu.core_type<tc>, window_params = [{transform_indices = @transform_0, window_bounds = array<i64: 1>}, {transform_indices = @transform_1, window_bounds = array<i64: 1>}, {transform_indices = @transform_2, window_bounds = array<i64: 128, 128>}, {transform_indices = @transform_3, window_bounds = array<i64: 128, 128>}]} {
    %c0 = arith.constant 0 : index
    %0 = memref.load %arg2[%c0] : memref<1xf32, #tpu.memory_space<smem>>
    %c0_0 = arith.constant 0 : index
    %1 = memref.load %arg3[%c0_0] : memref<1xf32, #tpu.memory_space<smem>>
    %c0_1 = arith.constant 0 : index
    %c0_2 = arith.constant 0 : index
    %2 = vector.load %arg4[%c0_1, %c0_2] : memref<128x128xf32, #tpu.memory_space<vmem>>, vector<128x128xf32>
    %3 = vector.broadcast %0 : f32 to vector<128x128xf32>
    %4 = arith.divf %2, %3 : vector<128x128xf32>
    %5 = vector.broadcast %1 : f32 to vector<128x128xf32>
    %6 = arith.addf %4, %5 : vector<128x128xf32>
    %7 = math.roundeven %6 : vector<128x128xf32>
    %cst = arith.constant -1.280000e+02 : f32
    %cst_3 = arith.constant 1.270000e+02 : f32
    %8 = vector.broadcast %cst : f32 to vector<128x128xf32>
    %9 = arith.maximumf %8, %7 : vector<128x128xf32>
    %10 = vector.broadcast %cst_3 : f32 to vector<128x128xf32>
    %11 = arith.minimumf %10, %9 : vector<128x128xf32>
    %12 = vector.broadcast %1 : f32 to vector<128x128xf32>
    %13 = arith.subf %11, %12 : vector<128x128xf32>
    %14 = arith.truncf %13 : vector<128x128xf32> to vector<128x128xbf16>
    %c0_4 = arith.constant 0 : index
    %c0_5 = arith.constant 0 : index
    %15 = vector.load %arg5[%c0_4, %c0_5] : memref<128x128xbf16, #tpu.memory_space<vmem>>, vector<128x128xbf16>
    tpu.vector_store %arg5[%c0_4, %c0_5], %14 {strides = array<i32>} : memref<128x128xbf16, #tpu.memory_space<vmem>>, vector<128x128xbf16>,
    return
  }
  func.func @transform_0(%arg0: i32, %arg1: i32) -> i32 {
    %c0_i32 = arith.constant 0 : i32
    %c0_i32_0 = arith.constant 0 : i32
    return %c0_i32 : i32
  }
  func.func @transform_1(%arg0: i32, %arg1: i32) -> i32 {
    %c0_i32 = arith.constant 0 : i32
    %c0_i32_0 = arith.constant 0 : i32
    return %c0_i32 : i32
  }
  func.func @transform_2(%arg0: i32, %arg1: i32) -> (i32, i32) {
    %c0_i32 = arith.constant 0 : i32
    return %arg0, %arg1 : i32, i32
  }
  func.func @transform_3(%arg0: i32, %arg1: i32) -> (i32, i32) {
    %c0_i32 = arith.constant 0 : i32
    return %arg0, %arg1 : i32, i32
  }
}

</mosaic_0001>

<bundles_post_ra>
// kernel: tpu_custom_call.1
= control target key start
LH: loop header
LB: loop body
LE: loop exit
PB: predicated region body
PF: predicated region fallthrough
CT: control target
= control target key end

     0   :  { %10 = vsyncpa [#allocation5], 0  ;;  %s690_s0 = inlined_call_operand.<no memory space> [shape: f32[1], index: 0, kind: input, shape index: {}]   ;;  %s691_s1 = inlined_call_operand.<no memory space> [shape: f32[1], index: 1, kind: input, shape index: {}]   ;;  %s692_s2 = inlined_call_operand.hbm [shape: f32[128,128], index: 2, kind: input, shape index: {}]   ;;  %s693_s3 = inlined_call_operand.hbm [shape: bf16[128,128], index: 3, kind: output, shape index: {}]  }
   0x1   :  { %11 = vsyncpa [#allocation6], 0  ;;  %s504_s12 = smov [#allocation4]  }
   0x2   :  { %s21_s13 = sshll.u32 %s504_s12, 4  ;;  %s22_s13 = int_to_ptr.vmem [resolvable:$true] %s21_s13 }
   0x3   :  { %s468_s14 = scalar_lea.vmem %s22_s13, 2048  ;;  %p473_p1 = scmp.lt.s32.totalorder %s22_s13, %s22_s13 }
   0x4   :  { %p469_p0 = scmp.ne.s32.totalorder %s22_s13, %s468_s14  ;;  %p474_p2 = scmp.lt.s32.totalorder %s468_s14, %s468_s14 }
   0x6   :  { %p475_p3 = por %p474_p2, %p473_p1 }
   0x8   :  { %p476_p4 = pnand %p475_p3, %p469_p0 }
   0xa   :  { %479 = shalt.err (!%p476_p4)
}
   0xb   :  { %s505_s15 = smov 128   ;;  %s506_s16 = smov 8  }
   0xc   :  { %27 = dma.hbm_to_vmem [thread:$0]  %s692_s2, 2048, %s22_s13, [#allocation5], %s505_s15, %s505_s15, %s506_s16  }
   0xd   :  { %500 = dma.done.wait [#allocation5], 2048  }
   0xe   :  { %501 = vsyncadd [#allocation5], 4294965248  ;;  %v49_v0 = vstv %s690_s0  ;;  %v33_v1 = vld [vmem:[#allocation4] sm:$0xff]  ;;  %v34_v2 = vld [vmem:[#allocation4 + $0x8] sm:$0xff]  ;;  %v541_v10 = vstv %s691_s1  ;;  %s507_s0 = smov [#allocation7]  }
   0xf   :  { %458 = vrcp.f32 %v49_v0  ;;  %v35_v3 = vld [vmem:[#allocation4 + $0x10] sm:$0xff]  ;;  %v36_v4 = vld [vmem:[#allocation4 + $0x18] sm:$0xff]  ;;  %v37_v5 = vld [vmem:[#allocation4 + $0x20] sm:$0xff]  ;;  %s233_s1 = sshll.u32 %s507_s0, 4  ;;  %s234_s1 = int_to_ptr.vmem [resolvable:$true] %s233_s1 }
  0x10   :  { %v38_v6 = vld [vmem:[#allocation4 + $0x28] sm:$0xff]  ;;  %v39_v7 = vld [vmem:[#allocation4 + $0x30] sm:$0xff]  ;;  %v40_v8 = vld [vmem:[#allocation4 + $0x38] sm:$0xff]  ;;  %s480_s2 = scalar_lea.vmem %s234_s1, 1024  ;;  %p485_p6 = scmp.lt.s32.totalorder %s234_s1, %s234_s1 }
  0x11   :  { %v42_v36 = vld [vmem:[#allocation4 + $0x48] sm:$0xff]  ;;  %p481_p5 = scmp.ne.s32.totalorder %s234_s1, %s480_s2  ;;  %p486_p7 = scmp.lt.s32.totalorder %s480_s2, %s480_s2 }
  0x13   :  { %p487_p8 = por %p486_p7, %p485_p6 }
  0x15   :  { %p488_p9 = pnand %p487_p8, %p481_p5 }
  0x1c   :  { %v536_v9 = vpop.eup %458 }
  0x1d   :  { %v51_v11 = vmul.f32 %v536_v9, %v33_v1  ;;  %v52_v12 = vmul.f32 %v536_v9, %v34_v2  ;;  %v53_v13 = vmul.f32 %v536_v9, %v35_v3  ;;  %v54_v14 = vmul.f32 %v536_v9, %v36_v4 }
  0x1e   :  { %v55_v15 = vmul.f32 %v536_v9, %v37_v5  ;;  %v56_v16 = vmul.f32 %v536_v9, %v38_v6  ;;  %v57_v17 = vmul.f32 %v536_v9, %v39_v7  ;;  %v58_v18 = vmul.f32 %v536_v9, %v40_v8 }
  0x1f   :  { %v68_v19 = vadd.f32 %v541_v10, %v51_v11  ;;  %v69_v20 = vadd.f32 %v541_v10, %v52_v12  ;;  %v70_v21 = vadd.f32 %v541_v10, %v53_v13  ;;  %v71_v22 = vadd.f32 %v541_v10, %v54_v14 }
  0x20   :  { %v72_v23 = vadd.f32 %v541_v10, %v55_v15  ;;  %v557_v24 = vadd.f32 %v541_v10, %v56_v16  ;;  %v560_v25 = vadd.f32 %v541_v10, %v57_v17  ;;  %v563_v29 = vadd.f32 %v541_v10, %v58_v18 }
  0x21   :  { %v324_v26 = vand.u32 2147483647, %v68_v19  ;;  %v326_v27 = vcvt.f32.s32 %v68_v19  ;;  %v332_v28 = vand.u32 2147483647, %v69_v20  ;;  %v329_v30 = vand.u32 2147483648, %v68_v19 }
  0x22   :  { %v334_v31 = vcvt.f32.s32 %v69_v20  ;;  %v340_v32 = vand.u32 2147483647, %v70_v21  ;;  %v342_v33 = vcvt.f32.s32 %v70_v21  ;;  %v337_v37 = vand.u32 2147483648, %v69_v20 }
  0x23   :  { %vm565_vm0 = vcmp.lt.f32.partialorder %v324_v26, 8388608.0  ;;  %v327_v35 = vcvt.s32.f32 %v326_v27  ;;  %vm569_vm1 = vcmp.lt.f32.partialorder %v332_v28, 8388608.0  ;;  %v345_v40 = vand.u32 2147483648, %v70_v21 }
  0x24   :  { %v335_v38 = vcvt.s32.f32 %v334_v31  ;;  %v343_v39 = vcvt.s32.f32 %v342_v33  ;;  %v348_v41 = vand.u32 2147483647, %v71_v22  ;;  %vm573_vm2 = vcmp.lt.f32.partialorder %v340_v32, 8388608.0 }
  0x25   :  { %v328_v42 = vand.u32 2147483647, %v327_v35  ;;  %v350_v44 = vcvt.f32.s32 %v71_v22  ;;  %v356_v45 = vand.u32 2147483647, %v72_v23  ;;  %v353_v48 = vand.u32 2147483648, %v71_v22  ;;  %v41_v35 = vld [vmem:[#allocation4 + $0x40] sm:$0xff] }
  0x26   :  { %v336_v46 = vand.u32 2147483647, %v335_v38  ;;  %v344_v47 = vand.u32 2147483647, %v343_v39  ;;  %v358_v49 = vcvt.f32.s32 %v72_v23  ;;  %vm577_vm3 = vcmp.lt.f32.partialorder %v348_v41, 8388608.0  ;;  %v43_v41 = vld [vmem:[#allocation4 + $0x50] sm:$0xff] }
  0x27   :  { %v330_v50 = vor.u32 %v329_v30, %v328_v42  ;;  %v351_v52 = vcvt.s32.f32 %v350_v44  ;;  %vm581_vm4 = vcmp.lt.f32.partialorder %v356_v45, 8388608.0  ;;  %v361_v57 = vand.u32 2147483648, %v72_v23 }
  0x28   :  { %v338_v54 = vor.u32 %v337_v37, %v336_v46  ;;  %v346_v55 = vor.u32 %v345_v40, %v344_v47  ;;  %v359_v56 = vcvt.s32.f32 %v358_v49  ;;  %v364_v60 = vand.u32 2147483647, %v557_v24  ;;  %v44_v46 = vld [vmem:[#allocation4 + $0x58] sm:$0xff] }
  0x29   :  { %v331_v58 = vsel %vm565_vm0, %v330_v50, %v68_v19  ;;  %v352_v59 = vand.u32 2147483647, %v351_v52  ;;  %v366_v61 = vcvt.f32.s32 %v557_v24  ;;  %v369_v5 = vand.u32 2147483648, %v557_v24  ;;  %v45_v50 = vld [vmem:[#allocation4 + $0x60] sm:$0xff]  ;;  %v48_v52 = vld [vmem:[#allocation4 + $0x78] sm:$0xff] }
  0x2a   :  { %v339_v62 = vsel %vm569_vm1, %v338_v54, %v69_v20  ;;  %v100_v63 = vmax.f32 %v331_v58, -128.0  ;;  %v347_v0 = vsel %vm573_vm2, %v346_v55, %v70_v21  ;;  %v360_v1 = vand.u32 2147483647, %v359_v56 }
  0x2b   :  { %v101_v2 = vmax.f32 %v339_v62, -128.0  ;;  %v354_v3 = vor.u32 %v353_v48, %v352_v59  ;;  %v102_v4 = vmax.f32 %v347_v0, -128.0  ;;  %v367_v8 = vcvt.s32.f32 %v366_v61 }
  0x2c   :  { %v116_v6 = vmin.f32 %v100_v63, 127.0  ;;  %v362_v7 = vor.u32 %v361_v57, %v360_v1  ;;  %v372_v11 = vand.u32 2147483647, %v560_v25  ;;  %v374_v15 = vcvt.f32.s32 %v560_v25 }
  0x2d   :  { %v117_v12 = vmin.f32 %v101_v2, 127.0  ;;  %v355_v13 = vsel %vm577_vm3, %v354_v3, %v71_v22  ;;  %v118_v14 = vmin.f32 %v102_v4, 127.0  ;;  %v368_v19 = vand.u32 2147483647, %v367_v8 }
  0x2e   :  { %v132_v16 = vsub.f32 %v116_v6, %v541_v10  ;;  %v103_v17 = vmax.f32 %v355_v13, -128.0  ;;  %v363_v18 = vsel %vm581_vm4, %v362_v7, %v72_v23  ;;  %vm603_vm5 = vcmp.lt.f32.partialorder %v364_v60, 8388608.0 }
  0x2f   :  { %v133_v20 = vsub.f32 %v117_v12, %v541_v10  ;;  %v134_v21 = vsub.f32 %v118_v14, %v541_v10  ;;  %v104_v27 = vmax.f32 %v363_v18, -128.0  ;;  %v370_v28 = vor.u32 %v369_v5, %v368_v19 }
  0x30   :  { %v119_v22 = vmin.f32 %v103_v17, 127.0  ;;  %v375_v30 = vcvt.s32.f32 %v374_v15  ;;  %v377_v31 = vand.u32 2147483648, %v560_v25  ;;  %v380_v34 = vand.u32 2147483647, %v563_v29 }
  0x31   :  { %v280_v32 = vpack.c.bf16 %v133_v20, %v132_v16  ;;  %v120_v33 = vmin.f32 %v104_v27, 127.0  ;;  %v382_v23 = vcvt.f32.s32 %v563_v29  ;;  %v371_v38 = vsel %vm603_vm5, %v370_v28, %v557_v24  ;;  %v46_v27 = vld [vmem:[#allocation4 + $0x68] sm:$0xff] }
  0x32   :  { %v135_v37 = vsub.f32 %v119_v22, %v541_v10  ;;  %vm614_vm6 = vcmp.lt.f32.partialorder %v372_v11, 8388608.0  ;;  %v376_v40 = vand.u32 2147483647, %v375_v30  ;;  %v105_v42 = vmax.f32 %v371_v38, -128.0 }
  0x33   :  { %281 = vst [vmem:[#allocation7] sm:$0xff] %v280_v32   ;;  %v136_v43 = vsub.f32 %v120_v33, %v541_v10  ;;  %v383_v44 = vcvt.s32.f32 %v382_v23  ;;  %v385_v45 = vand.u32 2147483648, %v563_v29  ;;  %v59_v49 = vmul.f32 %v536_v9, %v41_v35 }
  0x34   :  { %v285_v47 = vpack.c.bf16 %v135_v37, %v134_v21  ;;  %v378_v48 = vor.u32 %v377_v31, %v376_v40  ;;  %v60_v24 = vmul.f32 %v536_v9, %v42_v36  ;;  %v121_v51 = vmin.f32 %v105_v42, 127.0 }
  0x35   :  { %vm622_vm7 = vcmp.lt.f32.partialorder %v380_v34, 8388608.0  ;;  %v384_v53 = vand.u32 2147483647, %v383_v44  ;;  %v61_v54 = vmul.f32 %v536_v9, %v43_v41  ;;  %v76_v56 = vadd.f32 %v541_v10, %v59_v49 }
  0x36   :  { %317 = vst [vmem:[#allocation7 + $0x8] sm:$0xff] %v285_v47   ;;  %v379_v55 = vsel %vm614_vm6, %v378_v48, %v560_v25  ;;  %v77_v57 = vadd.f32 %v541_v10, %v60_v24  ;;  %v62_v58 = vmul.f32 %v536_v9, %v44_v46  ;;  %v137_v59 = vsub.f32 %v121_v51, %v541_v10 }
  0x37   :  { %v386_v60 = vor.u32 %v385_v45, %v384_v53  ;;  %v106_v61 = vmax.f32 %v379_v55, -128.0  ;;  %v63_v62 = vmul.f32 %v536_v9, %v45_v50  ;;  %v388_v63 = vand.u32 2147483647, %v76_v56 }
  0x38   :  { %v390_v0 = vcvt.f32.s32 %v76_v56  ;;  %v396_v1 = vand.u32 2147483647, %v77_v57  ;;  %v78_v2 = vadd.f32 %v541_v10, %v61_v54  ;;  %v290_v3 = vpack.c.bf16 %v137_v59, %v136_v43  ;;  %v47_v43 = vld [vmem:[#allocation4 + $0x70] sm:$0xff] }
  0x39   :  { %v387_v25 = vsel %vm622_vm7, %v386_v60, %v563_v29  ;;  %v122_v4 = vmin.f32 %v106_v61, 127.0  ;;  %v398_v5 = vcvt.f32.s32 %v77_v57  ;;  %vm639_vm8 = vcmp.lt.f32.partialorder %v388_v63, 8388608.0 }
  0x3a   :  { %v107_v6 = vmax.f32 %v387_v25, -128.0  ;;  %v391_v8 = vcvt.s32.f32 %v390_v0  ;;  %v393_v11 = vand.u32 2147483648, %v76_v56  ;;  %318 = vst [vmem:[#allocation7 + $0x10] sm:$0xff] %v290_v3   ;;  %v401_v14 = vand.u32 2147483648, %v77_v57 }
  0x3b   :  { %v138_v12 = vsub.f32 %v122_v4, %v541_v10  ;;  %v399_v13 = vcvt.s32.f32 %v398_v5  ;;  %v79_v15 = vadd.f32 %v541_v10, %v62_v58  ;;  %v404_v18 = vand.u32 2147483647, %v78_v2 }
  0x3c   :  { %v123_v16 = vmin.f32 %v107_v6, 127.0  ;;  %v392_v17 = vand.u32 2147483647, %v391_v8  ;;  %v406_v29 = vcvt.f32.s32 %v78_v2  ;;  %vm645_vm9 = vcmp.lt.f32.partialorder %v396_v1, 8388608.0 }
  0x3d   :  { %v400_v20 = vand.u32 2147483647, %v399_v13  ;;  %v409_v21 = vand.u32 2147483648, %v78_v2  ;;  %v414_v26 = vcvt.f32.s32 %v79_v15  ;;  %v412_v31 = vand.u32 2147483647, %v79_v15 }
  0x3e   :  { %v139_v22 = vsub.f32 %v123_v16, %v541_v10  ;;  %v394_v28 = vor.u32 %v393_v11, %v392_v17  ;;  %v407_v30 = vcvt.s32.f32 %v406_v29  ;;  %vm650_vm10 = vcmp.lt.f32.partialorder %v404_v18, 8388608.0 }
  0x3f   :  { %v402_v32 = vor.u32 %v401_v14, %v400_v20  ;;  %v415_v34 = vcvt.s32.f32 %v414_v26  ;;  %v417_v23 = vand.u32 2147483648, %v79_v15  ;;  %v64_v38 = vmul.f32 %v536_v9, %v46_v27 }
  0x40   :  { %v295_v35 = vpack.c.bf16 %v139_v22, %v138_v12  ;;  %v395_v36 = vsel %vm639_vm8, %v394_v28, %v76_v56  ;;  %v408_v37 = vand.u32 2147483647, %v407_v30  ;;  %v80_v42 = vadd.f32 %v541_v10, %v63_v62 }
  0x41   :  { %v403_v39 = vsel %vm645_vm9, %v402_v32, %v77_v57  ;;  %v108_v40 = vmax.f32 %v395_v36, -128.0  ;;  %v416_v41 = vand.u32 2147483647, %v415_v34  ;;  %vm413_vm11 = vcmp.lt.f32.partialorder %v412_v31, 8388608.0 }
  0x42   :  { %319 = vst [vmem:[#allocation7 + $0x18] sm:$0xff] %v295_v35   ;;  %v109_v44 = vmax.f32 %v403_v39, -128.0  ;;  %v410_v45 = vor.u32 %v409_v21, %v408_v37  ;;  %v81_v46 = vadd.f32 %v541_v10, %v64_v38  ;;  %v420_v49 = vand.u32 2147483647, %v80_v42 }
  0x43   :  { %v124_v47 = vmin.f32 %v108_v40, 127.0  ;;  %v418_v48 = vor.u32 %v417_v23, %v416_v41  ;;  %v422_v24 = vcvt.f32.s32 %v80_v42  ;;  %v65_v53 = vmul.f32 %v536_v9, %v47_v43 }
  0x44   :  { %v125_v50 = vmin.f32 %v109_v44, 127.0  ;;  %v411_v51 = vsel %vm650_vm10, %v410_v45, %v78_v2  ;;  %v425_v57 = vand.u32 2147483648, %v80_v42  ;;  %v428_v61 = vand.u32 2147483647, %v81_v46 }
  0x45   :  { %v140_v54 = vsub.f32 %v124_v47, %v541_v10  ;;  %v419_v55 = vsel %vm413_vm11, %v418_v48, %v79_v15  ;;  %v110_v56 = vmax.f32 %v411_v51, -128.0  ;;  %v423_v60 = vcvt.s32.f32 %v422_v24 }
  0x46   :  { %v141_v58 = vsub.f32 %v125_v50, %v541_v10  ;;  %v111_v59 = vmax.f32 %v419_v55, -128.0  ;;  %vm666_vm12 = vcmp.lt.f32.partialorder %v420_v49, 8388608.0  ;;  %v430_v0 = vcvt.f32.s32 %v81_v46 }
  0x47   :  { %v126_v62 = vmin.f32 %v110_v56, 127.0  ;;  %v66_v1 = vmul.f32 %v536_v9, %v48_v52  ;;  %v424_v25 = vand.u32 2147483647, %v423_v60  ;;  %v82_v4 = vadd.f32 %v541_v10, %v65_v53 }
  0x48   :  { %v300_v2 = vpack.c.bf16 %v141_v58, %v140_v54  ;;  %v127_v3 = vmin.f32 %v111_v59, 127.0  ;;  %v431_v6 = vcvt.s32.f32 %v430_v0  ;;  %v433_v7 = vand.u32 2147483648, %v81_v46 }
  0x49   :  { %v142_v5 = vsub.f32 %v126_v62, %v541_v10  ;;  %v83_v8 = vadd.f32 %v541_v10, %v66_v1  ;;  %v426_v12 = vor.u32 %v425_v57, %v424_v25  ;;  %vm675_vm13 = vcmp.lt.f32.partialorder %v428_v61, 8388608.0 }
  0x4a   :  { %320 = vst [vmem:[#allocation7 + $0x20] sm:$0xff] %v300_v2   ;;  %v143_v11 = vsub.f32 %v127_v3, %v541_v10  ;;  %v438_v9 = vcvt.f32.s32 %v82_v4  ;;  %v432_v14 = vand.u32 2147483647, %v431_v6  ;;  %v436_v15 = vand.u32 2147483647, %v82_v4 }
  0x4b   :  { %v441_v16 = vand.u32 2147483648, %v82_v4  ;;  %v446_v17 = vcvt.f32.s32 %v83_v8  ;;  %v427_v29 = vsel %vm666_vm12, %v426_v12, %v80_v42  ;;  %v444_v20 = vand.u32 2147483647, %v83_v8 }
  0x4c   :  { %v305_v18 = vpack.c.bf16 %v143_v11, %v142_v5  ;;  %v439_v19 = vcvt.s32.f32 %v438_v9  ;;  %v434_v21 = vor.u32 %v433_v7, %v432_v14  ;;  %v112_v26 = vmax.f32 %v427_v29, -128.0 }
  0x4d   :  { %v447_v27 = vcvt.s32.f32 %v446_v17  ;;  %v449_v28 = vand.u32 2147483648, %v83_v8  ;;  %vm437_vm14 = vcmp.lt.f32.partialorder %v436_v15, 8388608.0  ;;  %vm445_vm15 = vcmp.lt.f32.partialorder %v444_v20, 8388608.0 }
  0x4e   :  { %321 = vst [vmem:[#allocation7 + $0x28] sm:$0xff] %v305_v18   ;;  %v440_v22 = vand.u32 2147483647, %v439_v19  ;;  %v435_v30 = vsel %vm675_vm13, %v434_v21, %v81_v46  ;;  %v128_v31 = vmin.f32 %v112_v26, 127.0 }
  0x4f   :  { %v448_v32 = vand.u32 2147483647, %v447_v27  ;;  %v113_v33 = vmax.f32 %v435_v30, -128.0 }
  0x50   :  { %v442_v34 = vor.u32 %v441_v16, %v440_v22  ;;  %v144_v36 = vsub.f32 %v128_v31, %v541_v10 }
  0x51   :  { %v450_v23 = vor.u32 %v449_v28, %v448_v32  ;;  %v129_v35 = vmin.f32 %v113_v33, 127.0 }
  0x52   :  { %v443_v37 = vsel %vm437_vm14, %v442_v34, %v82_v4 }
  0x53   :  { %v451_v38 = vsel %vm445_vm15, %v450_v23, %v83_v8  ;;  %v114_v39 = vmax.f32 %v443_v37, -128.0  ;;  %v145_v40 = vsub.f32 %v129_v35, %v541_v10 }
  0x54   :  { %v115_v41 = vmax.f32 %v451_v38, -128.0 }
  0x55   :  { %v130_v42 = vmin.f32 %v114_v39, 127.0  ;;  %v310_v43 = vpack.c.bf16 %v145_v40, %v144_v36 }
  0x56   :  { %v131_v44 = vmin.f32 %v115_v41, 127.0 }
  0x57   :  { %v146_v45 = vsub.f32 %v130_v42, %v541_v10  ;;  %322 = vst [vmem:[#allocation7 + $0x30] sm:$0xff] %v310_v43  }
  0x58   :  { %v147_v46 = vsub.f32 %v131_v44, %v541_v10 }
  0x5a   :  { %v315_v47 = vpack.c.bf16 %v147_v46, %v146_v45 }
  0x5c   :  { %323 = vst [vmem:[#allocation7 + $0x38] sm:$0xff] %v315_v47  }
  0x5d   :  { %491 = shalt.err (!%p488_p9)
}
  0x5e   :  { %s508_s23 = smov 64   ;;  %s509_s24 = smov 4  }
  0x5f   :  { %239 = dma.vmem_to_hbm [thread:$0]  %s234_s1, 1024, %s693_s3, [#allocation6], %s508_s23, %s508_s23, %s509_s24  }
  0x60   :  { %502 = dma.done.wait [#allocation6], 1024  }
  0x61   :  { %503 = vsyncadd [#allocation6], 4294966272 }
  0x62   :  { %243 = vsyncpa [#allocation5], 1 }
  0x63   :  { %244 = vsyncpa [#allocation6], 1 }

</bundles_post_ra>
